<compile_context>
chip_gen: v7x
topology: tpu7x:2x2x1
jax: 0.10.0
libtpu: 0.0.40
codegen_flags: <defaults>
</compile_context>

<pallas_src>
import jax
import jax.numpy as jnp
from jax.experimental import pallas as pl
from jax.experimental.pallas import tpu as pltpu

# Sizing budget (conservative, fits all of v5e/v6e/v7x) and the scoped-VMEM
# limit we ask the compiler for (above v5e's 16 MiB default, below v7x's
# 64 MiB physical).
_VMEM_BUDGET_BYTES = 32 * 1024 * 1024
_VMEM_LIMIT_BYTES = 48 * 1024 * 1024


def _round_up(x, m):
    return (x + m - 1) // m * m


def _per_row_bytes(F, H, O, itemsize, double_buffered):
    """VMEM bytes per batch column in the transposed layout (sublane-padded)."""
    io = _round_up(F, 8) + _round_up(O, 8)          # x^T tile + out^T tile
    bufs = 2 if double_buffered else 1
    return itemsize * (bufs * io + _round_up(H, 8))  # + hidden intermediate


def _cost_estimate(B, F, H, O, itemsize):
    flops = 2 * B * (F * H + H * O)
    bytes_accessed = itemsize * (B * F + H * F + H + O * H + O + B * O)
    return pl.CostEstimate(flops=flops, transcendentals=0,
                           bytes_accessed=bytes_accessed)


def _make_kernel(n_feature, use_vpu_layer1):
    """Kernel over transposed tiles: xT (F,Bt), w1 (H,F), b1 (H,1),
    w2 (O,H), b2 (O,1), oT (O,Bt)."""

    def kernel(xT_ref, w1_ref, b1_ref, w2_ref, b2_ref, oT_ref):
        xT = xT_ref[...]                      # (F, Bt)
        w1 = w1_ref[...]                      # (H, F)

        if use_vpu_layer1:
            # K = n_feature is tiny: a few broadcast FMAs on the VPU beat an
            # MXU pass that would only feed n_feature systolic rows.
            h = w1[:, 0:1] * xT[0:1, :]       # (H,1)*(1,Bt) -> (H,Bt)
            for f in range(1, n_feature):
                h = h + w1[:, f : f + 1] * xT[f : f + 1, :]
        else:
            h = jnp.dot(w1, xT, preferred_element_type=jnp.float32)

        h = jnp.maximum(h + b1_ref[...], 0.0)  # bias (H,1) broadcasts over lanes

        # Layer 2 (K = H) on the MXU, f32 accumulation; lane axis = batch.
        o = jnp.dot(w2_ref[...], h, preferred_element_type=jnp.float32)
        oT_ref[...] = (o + b2_ref[...]).astype(oT_ref.dtype)

    return kernel


def bp_forward(x, w1, b1, w2, b2, *, grid_free_max_rows=None, batch_tile=None):
    """Fused Linear->ReLU->Linear forward with PyTorch-layout parameters.

    x: (B, F); w1: (H, F); b1: (H,); w2: (O, H); b2: (O,).  Returns (B, O).
    """
    B, F = x.shape
    H = w1.shape[0]
    O = w2.shape[0]
    dtype = x.dtype

    # Batch -> lane axis (single cheap wrapper transpose); biases as columns.
    xT = x.T                                  # (F, B)
    b1c = b1.reshape(H, 1).astype(dtype)
    b2c = b2.reshape(O, 1).astype(dtype)

    kernel = _make_kernel(F, use_vpu_layer1=(F <= 8))
    cost = _cost_estimate(B, F, H, O, dtype.itemsize)

    if grid_free_max_rows is None:
        grid_free_max_rows = _VMEM_BUDGET_BYTES // _per_row_bytes(
            F, H, O, dtype.itemsize, double_buffered=False)

    if B <= grid_free_max_rows:
        # Whole problem in one VMEM block: no grid, no pipelining machinery,
        # no double buffering, no per-step overhead.
        outT = pl.pallas_call(
            kernel,
            out_shape=jax.ShapeDtypeStruct((O, B), dtype),
            in_specs=[pl.BlockSpec(memory_space=pltpu.MemorySpace.VMEM)] * 5,
            out_specs=pl.BlockSpec(memory_space=pltpu.MemorySpace.VMEM),
            compiler_params=pltpu.CompilerParams(
                vmem_limit_bytes=_VMEM_LIMIT_BYTES),
            cost_estimate=cost,
        )(xT, w1, b1c, w2, b2c)
        return outT.T

    # Huge batch: tile the lane (batch) axis.  Weights/biases stay
    # VMEM-resident via constant index_maps.  No wrapper pad/slice: a ragged
    # last tile is handled by Pallas' masked edge blocks (batch columns are
    # independent, so pad lanes never pollute valid output and are dropped
    # on store).
    if batch_tile is None:
        per_row = _per_row_bytes(F, H, O, dtype.itemsize, double_buffered=True)
        max_tile = max(128, (_VMEM_BUDGET_BYTES // per_row) // 128 * 128)
        nblocks = pl.cdiv(B, max_tile)
        if nblocks % 2:
            nblocks += 1          # even step count -> both v7x TCs stay busy
        batch_tile = min(max_tile, _round_up(pl.cdiv(B, nblocks), 128))
    else:
        batch_tile = _round_up(batch_tile, 128)

    grid = (pl.cdiv(B, batch_tile),)

    outT = pl.pallas_call(
        kernel,
        out_shape=jax.ShapeDtypeStruct((O, B), dtype),
        grid=grid,
        in_specs=[
            pl.BlockSpec((F, batch_tile), lambda i: (0, i)),   # x^T tile
            pl.BlockSpec((H, F), lambda i: (0, 0)),            # resident w1
            pl.BlockSpec((H, 1), lambda i: (0, 0)),            # resident b1
            pl.BlockSpec((O, H), lambda i: (0, 0)),            # resident w2
            pl.BlockSpec((O, 1), lambda i: (0, 0)),            # resident b2
        ],
        out_specs=pl.BlockSpec((O, batch_tile), lambda i: (0, i)),
        compiler_params=pltpu.CompilerParams(
            dimension_semantics=("parallel",),   # v7x: shard batch over 2 TCs
            vmem_limit_bytes=_VMEM_LIMIT_BYTES),
        cost_estimate=cost,
    )(xT, w1, b1c, w2, b2c)
    return outT.T


def init_params(key, n_feature, n_hidden, n_output, dtype=jnp.float32):
    """torch.nn.Linear default init, PyTorch parameter layout."""
    k1, k2, k3, k4 = jax.random.split(key, 4)
    bound1 = 1.0 / float(n_feature) ** 0.5
    bound2 = 1.0 / float(n_hidden) ** 0.5
    w1 = jax.random.uniform(k1, (n_hidden, n_feature), dtype, -bound1, bound1)
    b1 = jax.random.uniform(k2, (n_hidden,), dtype, -bound1, bound1)
    w2 = jax.random.uniform(k3, (n_output, n_hidden), dtype, -bound2, bound2)
    b2 = jax.random.uniform(k4, (n_output,), dtype, -bound2, bound2)
    return w1, b1, w2, b2


def _ref(x, w1, b1, w2, b2):
    return jnp.maximum(x @ w1.T + b1, 0.0) @ w2.T + b2


if __name__ == "__main__":
    n_feature, n_hidden, n_output = 4, 32, 3

    key = jax.random.PRNGKey(0)
    kx1, kx2, kx3, kp = jax.random.split(key, 4)
    w1, b1, w2, b2 = init_params(kp, n_feature, n_hidden, n_output)

    # 1) Small batch (the shape regime of the original demo) -> grid-free path.
    x1 = jax.random.normal(kx1, (8, n_feature), jnp.float32)
    out1 = jax.block_until_ready(bp_forward(x1, w1, b1, w2, b2))
    assert out1.shape == (8, n_output)
    assert jnp.allclose(out1, _ref(x1, w1, b1, w2, b2), atol=1e-5, rtol=1e-5)

    # 2) Ragged batch (not a multiple of 8/128) -> still grid-free, no pad.
    x2 = jax.random.normal(kx2, (1000, n_feature), jnp.float32)
    out2 = jax.block_until_ready(bp_forward(x2, w1, b1, w2, b2))
    assert out2.shape == (1000, n_output)
    assert jnp.allclose(out2, _ref(x2, w1, b1, w2, b2), atol=1e-5, rtol=1e-5)

    # 3) Force the batch-tiled grid path (resident weights, even "parallel"
    #    grid) by overriding the grid-free threshold and tile.
    x3 = jax.random.normal(kx3, (2048, n_feature), jnp.float32)
    out3 = jax.block_until_ready(
        bp_forward(x3, w1, b1, w2, b2, grid_free_max_rows=256, batch_tile=512))
    assert out3.shape == (2048, n_output)
    assert jnp.allclose(out3, _ref(x3, w1, b1, w2, b2), atol=1e-5, rtol=1e-5)

    print("KERNEL_OK")
</pallas_src>

<mosaic_0001>
module attributes {stable_mosaic.version = 11 : i64} {
  func.func @kernel(%arg0: memref<4x8xf32, #tpu.memory_space<vmem>>, %arg1: memref<32x4xf32, #tpu.memory_space<vmem>>, %arg2: memref<32x1xf32, #tpu.memory_space<vmem>>, %arg3: memref<3x32xf32, #tpu.memory_space<vmem>>, %arg4: memref<3x1xf32, #tpu.memory_space<vmem>>, %arg5: memref<3x8xf32, #tpu.memory_space<vmem>>) attributes {dimension_semantics = [], scalar_prefetch = 0 : i64, scratch_operands = 0 : i64, tpu.core_type = #tpu.core_type<tc>} {
    %c0 = arith.constant 0 : index
    %c0_0 = arith.constant 0 : index
    %0 = vector.load %arg0[%c0, %c0_0] : memref<4x8xf32, #tpu.memory_space<vmem>>, vector<4x8xf32>
    %c0_1 = arith.constant 0 : index
    %c0_2 = arith.constant 0 : index
    %1 = vector.load %arg1[%c0_1, %c0_2] : memref<32x4xf32, #tpu.memory_space<vmem>>, vector<32x4xf32>
    %2 = vector.extract_strided_slice %1 {offsets = [0, 0], sizes = [32, 1], strides = [1, 1]} : vector<32x4xf32> to vector<32x1xf32>
    %3 = vector.extract_strided_slice %0 {offsets = [0, 0], sizes = [1, 8], strides = [1, 1]} : vector<4x8xf32> to vector<1x8xf32>
    %4 = vector.broadcast %2 : vector<32x1xf32> to vector<32x8xf32>
    %5 = vector.broadcast %3 : vector<1x8xf32> to vector<32x8xf32>
    %6 = arith.mulf %4, %5 : vector<32x8xf32>
    %7 = vector.extract_strided_slice %1 {offsets = [0, 1], sizes = [32, 1], strides = [1, 1]} : vector<32x4xf32> to vector<32x1xf32>
    %8 = vector.extract_strided_slice %0 {offsets = [1, 0], sizes = [1, 8], strides = [1, 1]} : vector<4x8xf32> to vector<1x8xf32>
    %9 = vector.broadcast %7 : vector<32x1xf32> to vector<32x8xf32>
    %10 = vector.broadcast %8 : vector<1x8xf32> to vector<32x8xf32>
    %11 = arith.mulf %9, %10 : vector<32x8xf32>
    %12 = arith.addf %6, %11 : vector<32x8xf32>
    %13 = vector.extract_strided_slice %1 {offsets = [0, 2], sizes = [32, 1], strides = [1, 1]} : vector<32x4xf32> to vector<32x1xf32>
    %14 = vector.extract_strided_slice %0 {offsets = [2, 0], sizes = [1, 8], strides = [1, 1]} : vector<4x8xf32> to vector<1x8xf32>
    %15 = vector.broadcast %13 : vector<32x1xf32> to vector<32x8xf32>
    %16 = vector.broadcast %14 : vector<1x8xf32> to vector<32x8xf32>
    %17 = arith.mulf %15, %16 : vector<32x8xf32>
    %18 = arith.addf %12, %17 : vector<32x8xf32>
    %19 = vector.extract_strided_slice %1 {offsets = [0, 3], sizes = [32, 1], strides = [1, 1]} : vector<32x4xf32> to vector<32x1xf32>
    %20 = vector.extract_strided_slice %0 {offsets = [3, 0], sizes = [1, 8], strides = [1, 1]} : vector<4x8xf32> to vector<1x8xf32>
    %21 = vector.broadcast %19 : vector<32x1xf32> to vector<32x8xf32>
    %22 = vector.broadcast %20 : vector<1x8xf32> to vector<32x8xf32>
    %23 = arith.mulf %21, %22 : vector<32x8xf32>
    %24 = arith.addf %18, %23 : vector<32x8xf32>
    %c0_3 = arith.constant 0 : index
    %c0_4 = arith.constant 0 : index
    %25 = vector.load %arg2[%c0_3, %c0_4] : memref<32x1xf32, #tpu.memory_space<vmem>>, vector<32x1xf32>
    %26 = vector.broadcast %25 : vector<32x1xf32> to vector<32x8xf32>
    %27 = arith.addf %24, %26 : vector<32x8xf32>
    %cst = arith.constant 0.000000e+00 : f32
    %28 = vector.broadcast %cst : f32 to vector<32x8xf32>
    %29 = arith.maximumf %27, %28 : vector<32x8xf32>
    %c0_5 = arith.constant 0 : index
    %c0_6 = arith.constant 0 : index
    %30 = vector.load %arg3[%c0_5, %c0_6] : memref<3x32xf32, #tpu.memory_space<vmem>>, vector<3x32xf32>
    %cst_7 = arith.constant dense<0.000000e+00> : vector<3x8xf32>
    %31 = tpu.matmul %30, %29, %cst_7 {dimension_numbers = #tpu.dot_dimension_numbers<[1], [0], [0], [1], [0, 0, 1, 1], [], []>} : vector<3x32xf32>, vector<32x8xf32>, vector<3x8xf32> -> vector<3x8xf32>
    %c0_8 = arith.constant 0 : index
    %c0_9 = arith.constant 0 : index
    %32 = vector.load %arg4[%c0_8, %c0_9] : memref<3x1xf32, #tpu.memory_space<vmem>>, vector<3x1xf32>
    %33 = vector.broadcast %32 : vector<3x1xf32> to vector<3x8xf32>
    %34 = arith.addf %31, %33 : vector<3x8xf32>
    %c0_10 = arith.constant 0 : index
    %c0_11 = arith.constant 0 : index
    %35 = vector.load %arg5[%c0_10, %c0_11] : memref<3x8xf32, #tpu.memory_space<vmem>>, vector<3x8xf32>
    tpu.vector_store %arg5[%c0_10, %c0_11], %34 {strides = array<i32>} : memref<3x8xf32, #tpu.memory_space<vmem>>, vector<3x8xf32>,
    return
  }
}

</mosaic_0001>

<bundles_post_ra>
// kernel: tpu_custom_call.1
= control target key start
LH: loop header
LB: loop body
LE: loop exit
PB: predicated region body
PF: predicated region fallthrough
CT: control target
= control target key end

     0   :  { %v333_v1 = vmov 3   ;;  %v334_v2 = vmov 1   ;;  %s418_s0 = inlined_call_operand.vmem [shape: f32[4,8], index: 0, kind: input, shape index: {}]   ;;  %s419_s1 = inlined_call_operand.vmem [shape: f32[32,4], index: 1, kind: input, shape index: {}]   ;;  %s420_s2 = inlined_call_operand.vmem [shape: f32[32,1], index: 2, kind: input, shape index: {}]   ;;  %s421_s3 = inlined_call_operand.vmem [shape: f32[3,32], index: 3, kind: input, shape index: {}]   ;;  %s422_s4 = inlined_call_operand.vmem [shape: f32[3,1], index: 4, kind: input, shape index: {}]   ;;  %s423_s5 = inlined_call_operand.hbm [shape: f32[3,8], index: 5, kind: output, shape index: {}]  }
   0x1   :  { %v22_v0 = vld [vmem:[%s419_s1] sm:$0xff]  ;;  %302 = vset.pattern.permute.xlu0 %v333_v1  ;;  %298 = vset.pattern.permute.xlu1 %v334_v2  ;;  %v23_v3 = vld [vmem:[%s419_s1 + $0x8] sm:$0xff] }
   0x2   :  { %111 = vperm.xlu0 %302, %v22_v0   ;;  %55 = vperm.xlu1 %298, %v22_v0  }
   0x3   :  { %10 = vsyncpa [#allocation3], 0  ;;  %v335_v4 = vmov 2   ;;  %v25_v5 = vld [vmem:[%s419_s1 + $0x18] sm:$0xff]  ;;  %v24_v6 = vld [vmem:[%s419_s1 + $0x10] sm:$0xff]  ;;  %v336_v7 = vmov 0   ;;  %v46_v22 = vlaneseq }
   0x4   :  { %v138_v8 = vld [vmem:[%s420_s2] sm:$0xff]  ;;  %v141_v9 = vld [vmem:[%s420_s2 + $0x18] sm:$0xff]  ;;  %v139_v10 = vld [vmem:[%s420_s2 + $0x8] sm:$0xff]  ;;  %v337_v13 = vmov 0.0|0.0   ;;  %vm338_vm0 = vmmov 0   ;;  %v339_v14 = vmov 0.0  }
   0x5   :  { %v140_v11 = vld [vmem:[%s420_s2 + $0x10] sm:$0xff]  ;;  %v171_v12 = vld [vmem:[%s422_s4] sm:$0x7]  ;;  %284 = vmatprep.subr.bf16.mxu0 %v337_v13  ;;  %281 = vmatprep.mubr.msk.f32.mxu0 %vm338_vm0, %v339_v14  ;;  %v47_v25 = vshrl.u32 %v46_v22, 7  ;;  %vm177_vm1 = vcmask 261120   ;;  %s340_s11 = smov [#allocation2]  }
   0x6   :  { %303 = vset.pattern.permute.xlu0 %v335_v4  ;;  %59 = vperm.xlu1 %298, %v23_v3   ;;  %v21_v29 = vld [vmem:[%s418_s0] sm:$0xf]  ;;  %s259_s12 = sshll.u32 %s340_s11, 4  ;;  %vm251_vm2 = vcmask 59392   ;;  %s260_s12 = int_to_ptr.vmem [resolvable:$true] %s259_s12 }
   0x7   :  { %83 = vperm.xlu0 %303, %v22_v0   ;;  %v48_v27 = vsub.s32 0, %v47_v25  ;;  %v72_v28 = vsub.s32 1, %v47_v25  ;;  %v100_v33 = vsub.s32 2, %v47_v25  ;;  %v128_v35 = vsub.s32 3, %v47_v25  ;;  %s309_s13 = scalar_lea.vmem %s260_s12, 64  ;;  %p314_p1 = scmp.lt.s32.totalorder %s260_s12, %s260_s12 }
   0x8   :  { %p310_p0 = scmp.ne.s32.totalorder %s260_s12, %s309_s13  ;;  %p315_p2 = scmp.lt.s32.totalorder %s309_s13, %s309_s13 }
   0x9   :  { %v49_v31 = vrot.slane %v21_v29, %v48_v27  ;;  %v73_v34 = vrot.slane %v21_v29, %v72_v28  ;;  %v101_v37 = vrot.slane %v21_v29, %v100_v33  ;;  %v129_v41 = vrot.slane %v21_v29, %v128_v35 }
   0xa   :  { %299 = vset.pattern.permute.xlu1 %v335_v4  ;;  %p316_p3 = por %p315_p2, %p314_p1 }
   0xb   :  { %95 = vperm.xlu0 %303, %v25_v5   ;;  %87 = vperm.xlu1 %299, %v23_v3  }
   0xc   :  { %p317_p4 = pnand %p316_p3, %p310_p0 }
   0xf   :  { %306 = vset.pattern.permute.xlu0 %v336_v7  ;;  %300 = vset.pattern.permute.xlu1 %v336_v7 }
  0x10   :  { %28 = vperm.xlu0 %306, %v22_v0   ;;  %38 = vperm.xlu1 %300, %v24_v6  }
  0x14   :  { %33 = vperm.xlu0 %306, %v23_v3   ;;  %301 = vset.pattern.permute.xlu1 %v334_v2 }
  0x15   :  { %63 = vperm.xlu1 %301, %v24_v6  }
  0x18   :  { %43 = vperm.xlu0 %306, %v25_v5  }
  0x19   :  { %67 = vperm.xlu1 %301, %v25_v5  }
  0x1c   :  { %144 = vperm.xlu0 %306, %v138_v8  }
  0x1d   :  { %304 = vset.pattern.permute.xlu1 %v333_v1 }
  0x1e   :  { %115 = vperm.xlu1 %304, %v23_v3  }
  0x20   :  { %159 = vperm.xlu0 %306, %v141_v9  }
  0x22   :  { %305 = vset.pattern.permute.xlu1 %v335_v4 }
  0x23   :  { %91 = vperm.xlu1 %305, %v24_v6  }
  0x27   :  { %307 = vset.pattern.permute.xlu1 %v333_v1 }
  0x28   :  { %119 = vperm.xlu1 %307, %v24_v6  }
  0x2c   :  { %123 = vperm.xlu1 %307, %v25_v5  }
  0x30   :  { %308 = vset.pattern.permute.xlu1 %v336_v7 }
  0x31   :  { %149 = vperm.xlu1 %308, %v139_v10  }
  0x35   :  { %154 = vperm.xlu1 %308, %v140_v11  }
  0x39   :  { %174 = vperm.xlu1 %308, %v171_v12  }
  0x81   :  { %v56_v15 = vpop.permute.xlu1 %55  ;;  %v112_v16 = vpop.permute.xlu0 %111 }
  0x82   :  { %v74_v40 = vmul.f32 %v73_v34, %v56_v15  ;;  %v130_v49 = vmul.f32 %v129_v41, %v112_v16 }
  0x85   :  { %v60_v17 = vpop.permute.xlu1 %59 }
  0x86   :  { %v84_v18 = vpop.permute.xlu0 %83  ;;  %v75_v47 = vmul.f32 %v73_v34, %v60_v17 }
  0x87   :  { %v102_v42 = vmul.f32 %v101_v37, %v84_v18 }
  0x8a   :  { %v88_v19 = vpop.permute.xlu1 %87  ;;  %v96_v21 = vpop.permute.xlu0 %95 }
  0x8b   :  { %v105_v50 = vmul.f32 %v101_v37, %v96_v21  ;;  %v103_v55 = vmul.f32 %v101_v37, %v88_v19  ;;  %v170_v21 = vld [vmem:[%s421_s3] sm:$0x7] }
  0x8f   :  { %v39_v20 = vpop.permute.xlu1 %38  ;;  %v29_v24 = vpop.permute.xlu0 %28 }
  0x90   :  { %v50_v36 = vmul.f32 %v49_v31, %v29_v24  ;;  %v52_v58 = vmul.f32 %v49_v31, %v39_v20 }
  0x92   :  { %v78_v43 = vadd.f32 %v74_v40, %v50_v36 }
  0x93   :  { %v34_v30 = vpop.permute.xlu0 %33 }
  0x94   :  { %v64_v23 = vpop.permute.xlu1 %63  ;;  %v51_v44 = vmul.f32 %v49_v31, %v34_v30  ;;  %v106_v53 = vadd.f32 %v102_v42, %v78_v43 }
  0x95   :  { %v76_v54 = vmul.f32 %v73_v34, %v64_v23 }
  0x96   :  { %v79_v51 = vadd.f32 %v75_v47, %v51_v44  ;;  %v134_v61 = vadd.f32 %v130_v49, %v106_v53 }
  0x97   :  { %v44_v38 = vpop.permute.xlu0 %43  ;;  %v80_v1 = vadd.f32 %v76_v54, %v52_v58 }
  0x98   :  { %v68_v26 = vpop.permute.xlu1 %67  ;;  %v53_v45 = vmul.f32 %v49_v31, %v44_v38  ;;  %v107_v0 = vadd.f32 %v103_v55, %v79_v51 }
  0x99   :  { %v77_v46 = vmul.f32 %v73_v34, %v68_v26 }
  0x9b   :  { %v81_v52 = vadd.f32 %v77_v46, %v53_v45  ;;  %v145_v59 = vpop.permute.xlu0 %144 }
  0x9c   :  { %v162_v2 = vadd.f32 %v145_v59, %v134_v61 }
  0x9d   :  { %v116_v32 = vpop.permute.xlu1 %115  ;;  %v109_v63 = vadd.f32 %v105_v50, %v81_v52 }
  0x9e   :  { %v131_v56 = vmul.f32 %v129_v41, %v116_v32  ;;  %v166_v10 = vmax.f32 %v162_v2, 0.0 }
  0x9f   :  { %v160_v9 = vpop.permute.xlu0 %159 }
  0xa0   :  { %v135_v5 = vadd.f32 %v131_v56, %v107_v0 }
  0xa2   :  { %v92_v39 = vpop.permute.xlu1 %91 }
  0xa3   :  { %v104_v62 = vmul.f32 %v101_v37, %v92_v39 }
  0xa5   :  { %v108_v7 = vadd.f32 %v104_v62, %v80_v1 }
  0xa7   :  { %v120_v48 = vpop.permute.xlu1 %119 }
  0xa8   :  { %v132_v3 = vmul.f32 %v129_v41, %v120_v48 }
  0xaa   :  { %v136_v14 = vadd.f32 %v132_v3, %v108_v7 }
  0xab   :  { %v124_v57 = vpop.permute.xlu1 %123 }
  0xac   :  { %v133_v60 = vmul.f32 %v129_v41, %v124_v57 }
  0xae   :  { %v137_v4 = vadd.f32 %v133_v60, %v109_v63 }
  0xb0   :  { %v150_v6 = vpop.permute.xlu1 %149  ;;  %v165_v11 = vadd.f32 %v160_v9, %v137_v4 }
  0xb1   :  { %v163_v8 = vadd.f32 %v150_v6, %v135_v5 }
  0xb2   :  { %v169_v19 = vmax.f32 %v165_v11, 0.0 }
  0xb3   :  { %v167_v12 = vmax.f32 %v163_v8, 0.0 }
  0xb4   :  { %v155_v15 = vpop.permute.xlu1 %154 }
  0xb5   :  { %v164_v16 = vadd.f32 %v155_v15, %v136_v14  ;;  %v285_v17 = vpack.c.bf16 %v167_v12, %v166_v10 }
  0xb7   :  { %v168_v18 = vmax.f32 %v164_v16, 0.0  ;;  %286 = vmatpush3.bf16.msra.mxu0 %v285_v17 }
  0xb8   :  { %287 = vmatprep.subr.bf16.mxu0 %v337_v13  ;;  %v175_v22 = vpop.permute.xlu1 %174 }
  0xb9   :  { %v288_v20 = vpack.c.bf16 %v169_v19, %v168_v18 }
  0xbb   :  { %289 = vmatpush3.bf16.msra.mxu0 %v288_v20 }
  0xbe   :  { %282 = vmatmul.mubr.msk.f32.vlgmr.msra.gmra.mrb[0].mxu0 %vm177_vm1, %v170_v21 }
 0x191   :  { %v247_v23 = vpop.f32.mrb[0].mxu0 }
 0x192   :  { %v248_v24 = vadd.f32 %v247_v23, %v175_v22  ;;  %v283_v25 = vpop.f32.mrb[1].mxu0 }
 0x194   :  { %252 = vst.msk [vmem:[#allocation2] sm:$0x7] %vm251_vm2, %v248_v24 }
 0x195   :  { %320 = shalt.err (!%p317_p4)
}
 0x196   :  { %s321_s15 = scalar_lea.hbm %s423_s5, 64 }
 0x197   :  { %p322_p5 = scmp.ne.s32.totalorder %s423_s5, %s321_s15  ;;  %p325_p6 = scmp.lt.u32.totalorder %s321_s15, %s423_s5 }
 0x199   :  { %p327_p7 = pnand %p325_p6, %p322_p5 }
 0x19b   :  { %330 = shalt.err (!%p327_p7)
}
 0x19c   :  { %262 = dma.vmem_to_hbm [thread:$0]  %s260_s12, 64, %s423_s5, [#allocation3]  }
 0x19d   :  { %331 = dma.done.wait [#allocation3], 64  }
 0x19e   :  { %332 = vsyncadd [#allocation3], 4294967232 }
 0x19f   :  { %266 = vsyncpa [#allocation3], 1 }

</bundles_post_ra>
